<compile_context>
chip_gen: v6e
topology: v6e:2x2x1
jax: 0.10.0
libtpu: 0.0.40
codegen_flags: <defaults>
</compile_context>

<pallas_src>
import functools

import jax
import jax.numpy as jnp
from jax import lax
from jax.experimental import pallas as pl
from jax.experimental.pallas import tpu as pltpu


H1, H2, H3 = 128, 128, 64          # hidden sizes of the critic MLP
_STREAM_BUDGET = 8 * 1024 * 1024   # VMEM budget for the streamed x/out tiles


def _round_up(x, m):
    return ((x + m - 1) // m) * m


def _orthogonal(key, shape, gain):
    """Orthogonal init following torch.nn.init.orthogonal_ semantics."""
    rows, cols = shape
    a = jax.random.normal(key, (max(rows, cols), min(rows, cols)), jnp.float32)
    q, r = jnp.linalg.qr(a)
    d = jnp.sign(jnp.diagonal(r))
    d = jnp.where(d == 0, 1.0, d)          # avoid zeroing a column on a 0 diag
    q = q * d[None, :]
    if rows < cols:
        q = q.T
    return gain * q


def _const_spec(shape, *, single_buffer):
    """Grid-invariant (weight/bias) block: VMEM-resident across all steps."""
    index_map = lambda i: (0, 0)
    if single_buffer and hasattr(pl, "Buffered"):
        try:
            # Invariant blocks don't need double-buffering; halve their VMEM.
            return pl.BlockSpec(shape, index_map, pipeline_mode=pl.Buffered(1))
        except TypeError:   # older jax without the pipeline_mode kwarg
            pass
    return pl.BlockSpec(shape, index_map)


def critic_kernel(x_ref,
                  w1_ref, b1_ref,
                  w2_ref, b2_ref,
                  w3_ref, b3_ref,
                  w4_ref,
                  o_ref):
    """One batch tile: 3 bf16 MXU matmuls (f32 accum) + lane-dense 64->1 head."""
    # x tile (TM, D) bf16; weights bf16; bias-add / ReLU in f32.
    h = jnp.dot(x_ref[...], w1_ref[...],
                preferred_element_type=jnp.float32) + b1_ref[...]
    h = jnp.maximum(h, 0.0).astype(jnp.bfloat16)
    h = jnp.dot(h, w2_ref[...],
                preferred_element_type=jnp.float32) + b2_ref[...]
    h = jnp.maximum(h, 0.0).astype(jnp.bfloat16)
    h = jnp.dot(h, w3_ref[...],
                preferred_element_type=jnp.float32) + b3_ref[...]
    h = jnp.maximum(h, 0.0).astype(jnp.bfloat16)             # (TM, 64)
    # Final layer (64 -> 1), produced lane-dense: (1,64) . (TM,64)^T -> (1,TM)
    # so the HBM writeback is unmasked full-lane stores instead of TM/8
    # masked single-lane stores.  f32 accumulation; +b4 is folded in wrapper.
    v = lax.dot_general(w4_ref[...], h, (((1,), (1,)), ((), ())),
                        preferred_element_type=jnp.float32)
    o_ref[...] = v                                           # (1, TM) f32


@functools.partial(jax.jit, static_argnames=("tile_m",))
def critic_forward(x, params, *, tile_m=8192):
    """x: [B, input_dim] float32 -> value: [B, 1] float32."""
    (w1, b1), (w2, b2), (w3, b3), (w4, b4) = params
    B, D = x.shape

    # ---- tile selection (padding-aware, VMEM-aware, megacore-friendly) ----
    tile_m = max(8, _round_up(int(tile_m), 8))               # sublane rule
    # Streamed buffers: double-buffered bf16 x rows + double-buffered f32 out.
    bytes_per_row = 2 * (2 * D) + 2 * 4
    tm_vmem = max(8, (_STREAM_BUDGET // bytes_per_row) // 8 * 8)
    # Keep >= 2 grid steps so the "parallel" batch axis shards across both
    # v7x TensorCores (one extra ~0.35us step on v5e/v6e is negligible).
    tm_cores = max(8, _round_up(pl.cdiv(B, 2), 8))
    TM = min(tile_m, tm_vmem, tm_cores)
    grid_m = pl.cdiv(B, TM)
    TM = _round_up(pl.cdiv(B, grid_m), 8)     # bounds padding to < one tile
    B_pad = grid_m * TM

    # ---- operand preparation ----------------------------------------------
    x_bf = x.astype(jnp.bfloat16)
    if B_pad != B:
        x_bf = jnp.pad(x_bf, ((0, B_pad - B), (0, 0)))
    w1_bf = w1.astype(jnp.bfloat16)
    w2_bf = w2.astype(jnp.bfloat16)
    w3_bf = w3.astype(jnp.bfloat16)
    w4_row = w4.reshape(1, H3).astype(jnp.bfloat16)   # lane-major head weights

    # ---- VMEM accounting ----------------------------------------------------
    weight_bytes = 2 * (D * H1 + H1 * H2 + H2 * H3 + H3) + 4 * (H1 + H2 + H3)
    single_buffer_weights = weight_bytes > (2 << 20)   # only matters at big D
    stream_bytes = 2 * (TM * D * 2) + 2 * (TM * 4)
    vmem_need = stream_bytes + 2 * weight_bytes + (4 << 20)   # + headroom
    vmem_limit = int(min(max(vmem_need, 32 << 20), 56 << 20))
    # TODO(synk): for input_dim large enough that w1 alone stresses VMEM,
    # add a K grid axis for layer 1 instead of keeping all of w1 resident.

    cost = pl.CostEstimate(
        flops=2 * B_pad * (D * H1 + H1 * H2 + H2 * H3 + H3),
        transcendentals=0,
        bytes_accessed=B_pad * D * 2 + B_pad * 4 + weight_bytes,
    )

    const = functools.partial(_const_spec, single_buffer=single_buffer_weights)

    out = pl.pallas_call(
        critic_kernel,
        out_shape=jax.ShapeDtypeStruct((grid_m, 1, TM), jnp.float32),
        grid=(grid_m,),
        in_specs=[
            pl.BlockSpec((TM, D), lambda i: (i, 0)),   # x: streamed per tile
            const((D, H1)), const((1, H1)),
            const((H1, H2)), const((1, H2)),
            const((H2, H3)), const((1, H3)),
            const((1, H3)),                            # w4 row (1, 64)
        ],
        # Lane-dense output: one (1, TM) row per grid step.
        out_specs=pl.BlockSpec((None, 1, TM), lambda i: (i, 0, 0)),
        compiler_params=pltpu.CompilerParams(
            dimension_semantics=("parallel",),
            vmem_limit_bytes=vmem_limit),
        cost_estimate=cost,
    )(x_bf, w1_bf, b1, w2_bf, b2, w3_bf, b3, w4_row)

    # Fold the final bias here (review: drop the (1,1) VMEM stream).
    return out.reshape(-1)[:B, None] + b4


def init_params(key, input_dim):
    """Shapes/init mirror the PyTorch module (orthogonal weights, zero biases).
    Weights are stored [in, out] (transposed vs. nn.Linear's [out, in])."""
    k1, k2, k3, k4 = jax.random.split(key, 4)
    gain = float(jnp.sqrt(2.0))
    w1 = _orthogonal(k1, (input_dim, H1), gain)
    w2 = _orthogonal(k2, (H1, H2), gain)
    w3 = _orthogonal(k3, (H2, H3), gain)
    w4 = _orthogonal(k4, (H3, 1), 1.0)
    b1 = jnp.zeros((1, H1), jnp.float32)
    b2 = jnp.zeros((1, H2), jnp.float32)
    b3 = jnp.zeros((1, H3), jnp.float32)
    b4 = jnp.zeros((1, 1), jnp.float32)
    return ((w1, b1), (w2, b2), (w3, b3), (w4, b4))


def reference_forward(x, params):
    """Pure-JAX f32 reference of the same forward pass (correctness check)."""
    (w1, b1), (w2, b2), (w3, b3), (w4, b4) = params
    h = jnp.maximum(x @ w1 + b1, 0.0)
    h = jnp.maximum(h @ w2 + b2, 0.0)
    h = jnp.maximum(h @ w3 + b3, 0.0)
    return h @ w4 + b4


if __name__ == "__main__":
    key = jax.random.PRNGKey(0)
    kx, kp = jax.random.split(key)

    batch, input_dim = 8, 32
    x = jax.random.normal(kx, (batch, input_dim), dtype=jnp.float32)
    params = init_params(kp, input_dim)

    out = jax.block_until_ready(critic_forward(x, params))
    ref = reference_forward(x, params)
    assert out.shape == (batch, 1)
    # bf16 matmul inputs (f32 accumulation) vs the f32 reference.
    assert jnp.allclose(out, ref, atol=5e-2, rtol=5e-2)

    # Ragged batch exercising a multi-tile grid (grid=3, padded by < one tile).
    big_b = 300
    xb = jax.random.normal(kx, (big_b, input_dim), dtype=jnp.float32)
    outb = jax.block_until_ready(critic_forward(xb, params, tile_m=128))
    refb = reference_forward(xb, params)
    assert outb.shape == (big_b, 1)
    assert jnp.allclose(outb, refb, atol=5e-2, rtol=5e-2)

    print("KERNEL_OK")
</pallas_src>

<mosaic_0001>
module attributes {stable_mosaic.version = 11 : i64} {
  func.func @critic_kernel(%arg0: i32, %arg1: memref<8x32xbf16, #tpu.memory_space<vmem>>, %arg2: memref<32x128xbf16, #tpu.memory_space<vmem>>, %arg3: memref<1x128xf32, #tpu.memory_space<vmem>>, %arg4: memref<128x128xbf16, #tpu.memory_space<vmem>>, %arg5: memref<1x128xf32, #tpu.memory_space<vmem>>, %arg6: memref<128x64xbf16, #tpu.memory_space<vmem>>, %arg7: memref<1x64xf32, #tpu.memory_space<vmem>>, %arg8: memref<1x64xbf16, #tpu.memory_space<vmem>>, %arg9: memref<1x1x8xf32, #tpu.memory_space<vmem>>) attributes {dimension_semantics = [#tpu.dimension_semantics<parallel>], iteration_bounds = array<i64: 1>, scalar_prefetch = 0 : i64, scratch_operands = 0 : i64, tpu.core_type = #tpu.core_type<tc>, window_params = [{transform_indices = @transform_0, window_bounds = array<i64: 8, 32>}, {pipeline_mode = #tpu.pipeline_mode<synchronous>, transform_indices = @transform_1, window_bounds = array<i64: 32, 128>}, {pipeline_mode = #tpu.pipeline_mode<synchronous>, transform_indices = @transform_2, window_bounds = array<i64: 1, 128>}, {pipeline_mode = #tpu.pipeline_mode<synchronous>, transform_indices = @transform_3, window_bounds = array<i64: 128, 128>}, {pipeline_mode = #tpu.pipeline_mode<synchronous>, transform_indices = @transform_4, window_bounds = array<i64: 1, 128>}, {pipeline_mode = #tpu.pipeline_mode<synchronous>, transform_indices = @transform_5, window_bounds = array<i64: 128, 64>}, {pipeline_mode = #tpu.pipeline_mode<synchronous>, transform_indices = @transform_6, window_bounds = array<i64: 1, 64>}, {pipeline_mode = #tpu.pipeline_mode<synchronous>, transform_indices = @transform_7, window_bounds = array<i64: 1, 64>}, {transform_indices = @transform_8, window_bounds = array<i64: 1, 1, 8>}]} {
    %c0 = arith.constant 0 : index
    %c0_0 = arith.constant 0 : index
    %0 = vector.load %arg1[%c0, %c0_0] : memref<8x32xbf16, #tpu.memory_space<vmem>>, vector<8x32xbf16>
    %c0_1 = arith.constant 0 : index
    %c0_2 = arith.constant 0 : index
    %1 = vector.load %arg2[%c0_1, %c0_2] : memref<32x128xbf16, #tpu.memory_space<vmem>>, vector<32x128xbf16>
    %cst = arith.constant dense<0.000000e+00> : vector<8x128xf32>
    %2 = tpu.matmul %0, %1, %cst {dimension_numbers = #tpu.dot_dimension_numbers<[1], [0], [0], [1], [0, 0, 1, 1], [], []>} : vector<8x32xbf16>, vector<32x128xbf16>, vector<8x128xf32> -> vector<8x128xf32>
    %c0_3 = arith.constant 0 : index
    %c0_4 = arith.constant 0 : index
    %3 = vector.load %arg3[%c0_3, %c0_4] : memref<1x128xf32, #tpu.memory_space<vmem>>, vector<1x128xf32>
    %4 = vector.broadcast %3 : vector<1x128xf32> to vector<8x128xf32>
    %5 = arith.addf %2, %4 : vector<8x128xf32>
    %cst_5 = arith.constant 0.000000e+00 : f32
    %6 = vector.broadcast %cst_5 : f32 to vector<8x128xf32>
    %7 = arith.maximumf %5, %6 : vector<8x128xf32>
    %8 = arith.truncf %7 : vector<8x128xf32> to vector<8x128xbf16>
    %c0_6 = arith.constant 0 : index
    %c0_7 = arith.constant 0 : index
    %9 = vector.load %arg4[%c0_6, %c0_7] : memref<128x128xbf16, #tpu.memory_space<vmem>>, vector<128x128xbf16>
    %cst_8 = arith.constant dense<0.000000e+00> : vector<8x128xf32>
    %10 = tpu.matmul %8, %9, %cst_8 {dimension_numbers = #tpu.dot_dimension_numbers<[1], [0], [0], [1], [0, 0, 1, 1], [], []>} : vector<8x128xbf16>, vector<128x128xbf16>, vector<8x128xf32> -> vector<8x128xf32>
    %c0_9 = arith.constant 0 : index
    %c0_10 = arith.constant 0 : index
    %11 = vector.load %arg5[%c0_9, %c0_10] : memref<1x128xf32, #tpu.memory_space<vmem>>, vector<1x128xf32>
    %12 = vector.broadcast %11 : vector<1x128xf32> to vector<8x128xf32>
    %13 = arith.addf %10, %12 : vector<8x128xf32>
    %cst_11 = arith.constant 0.000000e+00 : f32
    %14 = vector.broadcast %cst_11 : f32 to vector<8x128xf32>
    %15 = arith.maximumf %13, %14 : vector<8x128xf32>
    %16 = arith.truncf %15 : vector<8x128xf32> to vector<8x128xbf16>
    %c0_12 = arith.constant 0 : index
    %c0_13 = arith.constant 0 : index
    %17 = vector.load %arg6[%c0_12, %c0_13] : memref<128x64xbf16, #tpu.memory_space<vmem>>, vector<128x64xbf16>
    %cst_14 = arith.constant dense<0.000000e+00> : vector<8x64xf32>
    %18 = tpu.matmul %16, %17, %cst_14 {dimension_numbers = #tpu.dot_dimension_numbers<[1], [0], [0], [1], [0, 0, 1, 1], [], []>} : vector<8x128xbf16>, vector<128x64xbf16>, vector<8x64xf32> -> vector<8x64xf32>
    %c0_15 = arith.constant 0 : index
    %c0_16 = arith.constant 0 : index
    %19 = vector.load %arg7[%c0_15, %c0_16] : memref<1x64xf32, #tpu.memory_space<vmem>>, vector<1x64xf32>
    %20 = vector.broadcast %19 : vector<1x64xf32> to vector<8x64xf32>
    %21 = arith.addf %18, %20 : vector<8x64xf32>
    %cst_17 = arith.constant 0.000000e+00 : f32
    %22 = vector.broadcast %cst_17 : f32 to vector<8x64xf32>
    %23 = arith.maximumf %21, %22 : vector<8x64xf32>
    %24 = arith.truncf %23 : vector<8x64xf32> to vector<8x64xbf16>
    %c0_18 = arith.constant 0 : index
    %c0_19 = arith.constant 0 : index
    %25 = vector.load %arg8[%c0_18, %c0_19] : memref<1x64xbf16, #tpu.memory_space<vmem>>, vector<1x64xbf16>
    %cst_20 = arith.constant dense<0.000000e+00> : vector<1x8xf32>
    %26 = tpu.matmul %25, %24, %cst_20 {dimension_numbers = #tpu.dot_dimension_numbers<[1], [1], [0], [0], [0, 0, 1, 0], [], []>} : vector<1x64xbf16>, vector<8x64xbf16>, vector<1x8xf32> -> vector<1x8xf32>
    %c0_21 = arith.constant 0 : index
    %c0_22 = arith.constant 0 : index
    %c0_23 = arith.constant 0 : index
    %27 = vector.load %arg9[%c0_21, %c0_22, %c0_23] : memref<1x1x8xf32, #tpu.memory_space<vmem>>, vector<1x1x8xf32>
    %28 = vector.shape_cast %27 : vector<1x1x8xf32> to vector<1x8xf32>
    %29 = vector.shape_cast %26 : vector<1x8xf32> to vector<1x1x8xf32>
    tpu.vector_store %arg9[%c0_21, %c0_22, %c0_23], %29 {strides = array<i32>} : memref<1x1x8xf32, #tpu.memory_space<vmem>>, vector<1x1x8xf32>,
    return
  }
  func.func @transform_0(%arg0: i32) -> (i32, i32) {
    %c0_i32 = arith.constant 0 : i32
    %c0_i32_0 = arith.constant 0 : i32
    return %arg0, %c0_i32 : i32, i32
  }
  func.func @transform_1(%arg0: i32) -> (i32, i32) {
    %c0_i32 = arith.constant 0 : i32
    %c0_i32_0 = arith.constant 0 : i32
    %c0_i32_1 = arith.constant 0 : i32
    return %c0_i32, %c0_i32_0 : i32, i32
  }
  func.func @transform_2(%arg0: i32) -> (i32, i32) {
    %c0_i32 = arith.constant 0 : i32
    %c0_i32_0 = arith.constant 0 : i32
    %c0_i32_1 = arith.constant 0 : i32
    return %c0_i32, %c0_i32_0 : i32, i32
  }
  func.func @transform_3(%arg0: i32) -> (i32, i32) {
    %c0_i32 = arith.constant 0 : i32
    %c0_i32_0 = arith.constant 0 : i32
    %c0_i32_1 = arith.constant 0 : i32
    return %c0_i32, %c0_i32_0 : i32, i32
  }
  func.func @transform_4(%arg0: i32) -> (i32, i32) {
    %c0_i32 = arith.constant 0 : i32
    %c0_i32_0 = arith.constant 0 : i32
    %c0_i32_1 = arith.constant 0 : i32
    return %c0_i32, %c0_i32_0 : i32, i32
  }
  func.func @transform_5(%arg0: i32) -> (i32, i32) {
    %c0_i32 = arith.constant 0 : i32
    %c0_i32_0 = arith.constant 0 : i32
    %c0_i32_1 = arith.constant 0 : i32
    return %c0_i32, %c0_i32_0 : i32, i32
  }
  func.func @transform_6(%arg0: i32) -> (i32, i32) {
    %c0_i32 = arith.constant 0 : i32
    %c0_i32_0 = arith.constant 0 : i32
    %c0_i32_1 = arith.constant 0 : i32
    return %c0_i32, %c0_i32_0 : i32, i32
  }
  func.func @transform_7(%arg0: i32) -> (i32, i32) {
    %c0_i32 = arith.constant 0 : i32
    %c0_i32_0 = arith.constant 0 : i32
    %c0_i32_1 = arith.constant 0 : i32
    return %c0_i32, %c0_i32_0 : i32, i32
  }
  func.func @transform_8(%arg0: i32) -> (i32, i32, i32) {
    %c0_i32 = arith.constant 0 : i32
    %c0_i32_0 = arith.constant 0 : i32
    %c0_i32_1 = arith.constant 0 : i32
    return %arg0, %c0_i32, %c0_i32_0 : i32, i32, i32
  }
}

</mosaic_0001>

<bundles_post_ra>
// kernel: critic_forward.1
= control target key start
LH: loop header
LB: loop body
LE: loop exit
PB: predicated region body
PF: predicated region fallthrough
CT: control target
= control target key end

     0   :  { %v500_v0 = vmov 0.0   ;;  %vm501_vm0 = vmmov 0   ;;  %vm54_vm1 = vcmask 261120   ;;  %vm327_vm2 = vcmask 523264   ;;  %s646_s1 = inlined_call_operand.vmem [shape: bf16[32,128], index: 1, kind: input, shape index: {}]   ;;  %s647_s3 = inlined_call_operand.vmem [shape: bf16[128,128], index: 3, kind: input, shape index: {}]   ;;  %s648_s0 = inlined_call_operand.vmem [shape: bf16[8,32], index: 0, kind: input, shape index: {}]   ;;  %s649_s5 = inlined_call_operand.vmem [shape: bf16[128,64], index: 5, kind: input, shape index: {}]   ;;  %s650_s2 = inlined_call_operand.vmem [shape: f32[1,128], index: 2, kind: input, shape index: {}]   ;;  %s651_s4 = inlined_call_operand.vmem [shape: f32[1,128], index: 4, kind: input, shape index: {}]   ;;  %s652_s6 = inlined_call_operand.vmem [shape: f32[1,64], index: 6, kind: input, shape index: {}]   ;;  %s653_s7 = inlined_call_operand.vmem [shape: bf16[1,64], index: 7, kind: input, shape index: {}]   ;;  %s654_s8 = inlined_call_operand.vmem [shape: f32[1,1,8], index: 8, kind: output, shape index: {}]  }
   0x1   :  { %426 = vmatprep.subr.bf16.mxu0 %v500_v0  ;;  %v482_v1 = vld [vmem:[%s646_s1 + $0x8] sm:$0xff]   ;;  %430 = vmatprep.mubr.msk.bf16.mxu0 %vm501_vm0, %v500_v0  ;;  %v483_v2 = vld [vmem:[%s646_s1] sm:$0xff]   ;;  %v484_v3 = vld [vmem:[%s647_s3 + $0x38] sm:$0xff]   ;;  %vm374_vm3 = vcmask 57344  }
   0x2   :  { %434 = vmatprep.subr.bf16.mxu1 %v500_v0  ;;  %450 = vmatprep.mubr.msk.bf16.mxu1 %vm501_vm0, %v500_v0  ;;  %v485_v4 = vld [vmem:[%s647_s3 + $0x30] sm:$0xff]   ;;  %v30_v5 = vld [vmem:[%s648_s0] sm:$0xf]  ;;  %v486_v6 = vld [vmem:[%s647_s3 + $0x28] sm:$0xff]  }
   0x3   :  { %427 = vmatpush3.bf16.msra.mxu0 %v482_v1  ;;  %435 = vmatpush3.bf16.msra.mxu1 %v484_v3  ;;  %v487_v7 = vld [vmem:[%s647_s3 + $0x20] sm:$0xff]   ;;  %v488_v8 = vld [vmem:[%s647_s3 + $0x18] sm:$0xff]   ;;  %v489_v9 = vld [vmem:[%s647_s3 + $0x10] sm:$0xff]  }
   0x4   :  { %428 = vmatprep.subr.bf16.mxu0 %v500_v0  ;;  %436 = vmatprep.subr.bf16.mxu1 %v500_v0  ;;  %v490_v10 = vld [vmem:[%s647_s3 + $0x8] sm:$0xff]   ;;  %v491_v11 = vld [vmem:[%s647_s3] sm:$0xff]   ;;  %v492_v12 = vld [vmem:[%s649_s5 + $0x38] sm:$0xff]  }
   0x5   :  { %v493_v13 = vld [vmem:[%s649_s5 + $0x30] sm:$0xff]   ;;  %v494_v14 = vld [vmem:[%s649_s5 + $0x28] sm:$0xff]   ;;  %v495_v15 = vld [vmem:[%s649_s5 + $0x20] sm:$0xff]  }
   0x6   :  { %v496_v16 = vld [vmem:[%s649_s5 + $0x18] sm:$0xff]   ;;  %v497_v17 = vld [vmem:[%s649_s5 + $0x10] sm:$0xff]   ;;  %v380_v18 = vld [vmem:[%s650_s2] ss:$0 sm:$0xff] }
   0x7   :  { %429 = vmatpush3.bf16.msra.mxu0 %v483_v2  ;;  %437 = vmatpush3.bf16.msra.mxu1 %v485_v4  ;;  %v498_v26 = vld [vmem:[%s649_s5 + $0x8] sm:$0xff]   ;;  %v499_v27 = vld [vmem:[%s649_s5] sm:$0xff]  }
   0x8   :  { %454 = vmatprep.subr.bf16.mxu0 %v500_v0  ;;  %438 = vmatprep.subr.bf16.mxu1 %v500_v0  ;;  %v384_v28 = vld [vmem:[%s651_s4] ss:$0 sm:$0xff] }
   0x9   :  { %v393_v36 = vld [vmem:[%s652_s6] ss:$0 sm:$0xff] }
   0xa   :  { %431 = vmatmul.mubr.msk.bf16.vlgmr.msra.gmra.mxu0 %vm54_vm1, %v30_v5  ;;  %v326_v45 = vld [vmem:[%s653_s7] sm:$0x1] }
   0xb   :  { %470 = vmatprep.mubr.msk.bf16.mxu0 %vm501_vm0, %v500_v0  ;;  %439 = vmatpush3.bf16.msra.mxu1 %v486_v6 }
   0xc   :  { %440 = vmatprep.subr.bf16.mxu1 %v500_v0  ;;  %455 = vmatpush3.bf16.msra.mxu0 %v492_v12 }
   0xd   :  { %456 = vmatprep.subr.bf16.mxu0 %v500_v0 }
   0xf   :  { %441 = vmatpush3.bf16.msra.mxu1 %v487_v7 }
  0x10   :  { %442 = vmatprep.subr.bf16.mxu1 %v500_v0  ;;  %457 = vmatpush3.bf16.msra.mxu0 %v493_v13 }
  0x11   :  { %458 = vmatprep.subr.bf16.mxu0 %v500_v0 }
  0x13   :  { %443 = vmatpush3.bf16.msra.mxu1 %v488_v8 }
  0x14   :  { %444 = vmatprep.subr.bf16.mxu1 %v500_v0  ;;  %459 = vmatpush3.bf16.msra.mxu0 %v494_v14 }
  0x15   :  { %460 = vmatprep.subr.bf16.mxu0 %v500_v0 }
  0x17   :  { %445 = vmatpush3.bf16.msra.mxu1 %v489_v9 }
  0x18   :  { %446 = vmatprep.subr.bf16.mxu1 %v500_v0  ;;  %461 = vmatpush3.bf16.msra.mxu0 %v495_v15 }
  0x19   :  { %462 = vmatprep.subr.bf16.mxu0 %v500_v0 }
  0x1b   :  { %447 = vmatpush3.bf16.msra.mxu1 %v490_v10 }
  0x1c   :  { %448 = vmatprep.subr.bf16.mxu1 %v500_v0  ;;  %463 = vmatpush3.bf16.msra.mxu0 %v496_v16 }
  0x1d   :  { %464 = vmatprep.subr.bf16.mxu0 %v500_v0 }
  0x1f   :  { %449 = vmatpush3.bf16.msra.mxu1 %v491_v11 }
  0x20   :  { %474 = vmatprep.subr.bf16.mxu1 %v500_v0  ;;  %465 = vmatpush3.bf16.msra.mxu0 %v497_v17 }
  0x21   :  { %466 = vmatprep.subr.bf16.mxu0 %v500_v0 }
  0x24   :  { %467 = vmatpush3.bf16.msra.mxu0 %v498_v26 }
  0x25   :  { %468 = vmatprep.subr.bf16.mxu0 %v500_v0 }
  0x28   :  { %469 = vmatpush3.bf16.msra.mxu0 %v499_v27 }
  0xca   :  { %v92_v19 = vpop.f32.mrf.mxu0 }
  0xcb   :  { %v93_v20 = vadd.f32 %v380_v18, %v92_v19 }
  0xcc   :  { %v432_v21 = vpop.f32.mrf.mxu0 }
  0xcd   :  { %v98_v22 = vmax.f32 %v93_v20, 0.0 }
  0xce   :  { %v95_v23 = vpop.f32.mrf.mxu0 }
  0xcf   :  { %v99_v24 = vpack.c.bf16 %v98_v22, %v98_v22 }
  0xd0   :  { %v433_v25 = vpop.f32.mrf.mxu0 }
  0xd1   :  { %451 = vmatmul.mubr.bf16.vlgmr.msra.gmra.mxu1 %v99_v24 }
  0xd2   :  { %476 = vmatprep.mubr.msk.bf16.mxu1 %vm501_vm0, %v500_v0 }
 0x191   :  { %v205_v29 = vpop.f32.mrf.mxu1 }
 0x192   :  { %v206_v30 = vadd.f32 %v384_v28, %v205_v29 }
 0x193   :  { %v452_v31 = vpop.f32.mrf.mxu1 }
 0x194   :  { %v211_v32 = vmax.f32 %v206_v30, 0.0 }
 0x195   :  { %v208_v33 = vpop.f32.mrf.mxu1 }
 0x196   :  { %v212_v34 = vpack.c.bf16 %v211_v32, %v211_v32 }
 0x197   :  { %v453_v35 = vpop.f32.mrf.mxu1 }
 0x198   :  { %471 = vmatmul.mubr.bf16.vlgmr.msra.gmra.mxu0 %v212_v34 }
 0x258   :  { %v318_v37 = vpop.f32.mrf.mxu0 }
 0x259   :  { %v319_v38 = vadd.f32 %v393_v36, %v318_v37 }
 0x25a   :  { %v472_v39 = vpop.f32.mrf.mxu0 }
 0x25b   :  { %v324_v40 = vmax.f32 %v319_v38, 0.0 }
 0x25c   :  { %v321_v41 = vpop.f32.mrf.mxu0 }
 0x25d   :  { %v325_v42 = vpack.c.bf16 %v324_v40, %v324_v40 }
 0x25e   :  { %v473_v43 = vpop.f32.mrf.mxu0 }
 0x25f   :  { %v332_v44 = vsel %vm327_vm2, %v325_v42, 0 }
 0x260   :  { %475 = vmatpush3.bf16.xpose.msra.mxu1 %v332_v44 }
 0x267   :  { %477 = vmatmul.mubr.msk.bf16.vlgmr.msra.gmra.mxu1 %vm327_vm2, %v326_v45 }
 0x327   :  { %v368_v46 = vpop.f32.mrf.mxu1 }
 0x328   :  { %375 = vst.msk [vmem:[%s654_s8] sm:$0x1] %vm374_vm3, %v368_v46 }
 0x329   :  { %v478_v47 = vpop.f32.mrf.mxu1 }
 0x32b   :  { %v371_v48 = vpop.f32.mrf.mxu1 }
 0x32d   :  { %v479_v49 = vpop.f32.mrf.mxu1 }

</bundles_post_ra>
